<compile_context>
chip_gen: v5e
topology: v5e:2x2
jax: 0.10.0
libtpu: 0.0.40
codegen_flags: <defaults>
</compile_context>

<pallas_src>
import jax
import jax.numpy as jnp
from jax.experimental import pallas as pl
from jax.experimental.pallas import tpu as pltpu


def _dma_copy_kernel(in_hbm, out_hbm, sem):
    # One whole-array HBM->HBM DMA; no VMEM staging, no grid.
    cp = pltpu.make_async_copy(in_hbm, out_hbm, sem)
    cp.start()
    cp.wait()


def _pallas_hbm_copy(xs):
    """Exact copy of `xs` through a single HBM->HBM DMA inside a Pallas call."""
    nbytes = xs.size * jnp.dtype(xs.dtype).itemsize
    return pl.pallas_call(
        _dma_copy_kernel,
        out_shape=jax.ShapeDtypeStruct(xs.shape, xs.dtype),
        in_specs=[pl.BlockSpec(memory_space=pl.ANY)],
        out_specs=pl.BlockSpec(memory_space=pl.ANY),
        scratch_shapes=[pltpu.SemaphoreType.DMA(())],
        cost_estimate=pl.CostEstimate(
            flops=0, transcendentals=0, bytes_accessed=2 * nbytes),
    )(xs)


def squeeze_pallas(x, dim, *, force_copy=True):
    """Pallas equivalent of torch.squeeze(x, dim).

    force_copy=False returns the metadata-only jnp.squeeze (the actual
    highest-performance path); force_copy=True routes the data through a
    single HBM->HBM DMA Pallas kernel.
    """
    ndim = x.ndim
    if dim < 0:
        dim += ndim
    if not (0 <= dim < ndim):
        raise ValueError(f"dim out of range for {ndim}-D tensor")

    # torch semantics: no-op if the dim is not size 1.
    if x.shape[dim] != 1:
        return x

    # Metadata-only squeeze (XLA handles any relayout before the kernel).
    xs = jnp.squeeze(x, axis=dim)

    if not force_copy:
        return xs
    if xs.size == 0 or xs.ndim == 0:
        # Nothing worth a DMA (empty tensor or scalar result).
        return xs

    return _pallas_hbm_copy(xs)


if __name__ == "__main__":
    key = jax.random.PRNGKey(0)

    # Squeeze(dim=1): input (B, 1, H, W) -> output (B, H, W)
    B, H, W = 2, 16, 32
    x = jax.random.normal(key, (B, 1, H, W), dtype=jnp.float32)

    out = jax.block_until_ready(squeeze_pallas(x, dim=1))
    ref = jnp.squeeze(x, axis=1)
    assert out.shape == (B, H, W), out.shape
    assert out.dtype == x.dtype
    assert jnp.array_equal(out, ref)

    # Negative dim (torch-style normalization).
    out_neg = jax.block_until_ready(squeeze_pallas(x, dim=-3))
    assert jnp.array_equal(out_neg, ref)

    # No-op case (dim not singleton): torch.squeeze returns input unchanged.
    y = jax.random.normal(key, (B, 4, H, W), dtype=jnp.float32)
    out2 = jax.block_until_ready(squeeze_pallas(y, dim=1))
    assert out2.shape == y.shape
    assert jnp.array_equal(out2, y)

    # bf16 case.
    z = jax.random.normal(key, (2, 1, 128, 256), dtype=jnp.bfloat16)
    out3 = jax.block_until_ready(squeeze_pallas(z, dim=1))
    assert out3.shape == (2, 128, 256)
    assert jnp.array_equal(out3, jnp.squeeze(z, axis=1))

    # Odd element count / ragged minor dims (previously a robustness cliff).
    odd = jax.random.normal(key, (3, 1, 5, 7), dtype=jnp.float32)
    out_odd = jax.block_until_ready(squeeze_pallas(odd, dim=1))
    assert out_odd.shape == (3, 5, 7)
    assert jnp.array_equal(out_odd, jnp.squeeze(odd, axis=1))

    # Squeeze of the last dim: (B, H, W, 1) -> (B, H, W).
    last = jax.random.normal(key, (2, 8, 16, 1), dtype=jnp.float32)
    out_last = jax.block_until_ready(squeeze_pallas(last, dim=-1))
    assert out_last.shape == (2, 8, 16)
    assert jnp.array_equal(out_last, jnp.squeeze(last, axis=-1))

    # Rank-reducing edge case: (1, 8) -> (8,)
    w = jax.random.normal(key, (1, 8), dtype=jnp.float32)
    out4 = jax.block_until_ready(squeeze_pallas(w, dim=0))
    assert out4.shape == (8,)
    assert jnp.array_equal(out4, jnp.squeeze(w, axis=0))

    # Fast (metadata-only) path.
    out5 = jax.block_until_ready(squeeze_pallas(x, dim=1, force_copy=False))
    assert jnp.array_equal(out5, ref)

    print("KERNEL_OK")
</pallas_src>

<mosaic_0001>
module attributes {stable_mosaic.version = 11 : i64} {
  func.func @_dma_copy_kernel(%arg0: memref<2x16x32xf32, #tpu.memory_space<any>>, %arg1: memref<2x16x32xf32, #tpu.memory_space<any>>, %arg2: memref<!tpu.dma_semaphore, #tpu.memory_space<semaphore_mem>>) attributes {dimension_semantics = [], scalar_prefetch = 0 : i64, scratch_operands = 1 : i64, tpu.core_type = #tpu.core_type<tc>} {
    tpu.enqueue_dma source(%arg0 : memref<2x16x32xf32, #tpu.memory_space<any>>) target(%arg1 : memref<2x16x32xf32, #tpu.memory_space<any>>) target_semaphore(%arg2 : memref<!tpu.dma_semaphore, #tpu.memory_space<semaphore_mem>>)
    tpu.wait_dma2 semaphore(%arg2 : memref<!tpu.dma_semaphore, #tpu.memory_space<semaphore_mem>>) src(%arg0 : memref<2x16x32xf32, #tpu.memory_space<any>>) dst(%arg1 : memref<2x16x32xf32, #tpu.memory_space<any>>)
    return
  }
}

</mosaic_0001>

<bundles_post_ra>
// kernel: tpu_custom_call.1
= control target key start
LH: loop header
LB: loop body
LE: loop exit
PB: predicated region body
PF: predicated region fallthrough
CT: control target
= control target key end

     0   :  { %s33_s12 = smov [#allocation2]   ;;  %s34_s13 = smov [#allocation3]   ;;  %s52_s0 = inlined_call_operand.hbm [shape: f32[2,16,32], index: 0, kind: input, shape index: {}]   ;;  %s53_s1 = inlined_call_operand.hbm [shape: f32[2,16,32], index: 1, kind: output, shape index: {}]  }
   0x1   :  { %s10_s8 = sshll.u32 %s52_s0, 4  ;;  %s12_s11 = sshll.u32 %s53_s1, 4  ;;  %s11_s8 = int_to_ptr.hbm [resolvable:$true] %s10_s8  ;;  %s13_s11 = int_to_ptr.hbm [resolvable:$true] %s12_s11 }
   0x2   :  { %s35_s14 = smov 0  }
   0x3   :  { %16 = dma.general %s11_s8, 512, %s13_s11, %s33_s12, %s34_s13, [#allocation4], %s35_s14, 0  }
   0x4   :  { %31 = dma.done.wait [#allocation2], 512 }
   0x5   :  { %32 = vsyncadd [#allocation2], 4294966784 }
   0x6   :  { %21 = vsyncmov [#allocation2] }
   0x9   :  { %s22_s15 = vpop.sfrf %21 }
   0xa   :  { %p27_p0 = scmp.ne.s32.totalorder %s22_s15, 0 }
   0xc   :  { %26 = shalt.err (%p27_p0)  }

</bundles_post_ra>
